<compile_context>
chip_gen: v5e
topology: v5e:2x2
jax: 0.10.0
libtpu: 0.0.40
codegen_flags: <defaults>
</compile_context>

<pallas_src>
import functools

import jax
import jax.numpy as jnp
from jax.experimental import pallas as pl
from jax.experimental.pallas import tpu as pltpu


def _embedding_net_kernel(
    x1_ref, x2_ref,                      # (TILE_B, OBS) each, f32
    w_in_ref, b_in_ref,                  # (OBS, H) cd     / (1, H) f32
    w_emb_ref, b_emb_ref,                # (H, E) cd       / (1, E) f32
    w_out1_ref, w_out2_ref, b_out_ref,   # (E, O) cd x2    / (1, O) f32
    ln_g_ref, ln_b_ref,                  # (1, O) f32
    w_o1_ref, b_o1_ref,                  # (O, A_pad) cd   / (1, A_pad) f32
    out_ref,                             # (TILE_B, A_pad) f32
    *, compute_dtype,
):
    tb = x1_ref.shape[0]
    cd = compute_dtype

    # Shared in_block + emb_block: merge the x1/x2 tiles in VMEM so both states
    # go through ONE matmul pair at double MXU row occupancy (no HBM stack).
    x = jnp.concatenate([x1_ref[...], x2_ref[...]], axis=0).astype(cd)

    h = jnp.dot(x, w_in_ref[...], preferred_element_type=jnp.float32)
    h = jnp.maximum(h + b_in_ref[...], 0.0).astype(cd)          # in_block ReLU

    e = jnp.dot(h, w_emb_ref[...], preferred_element_type=jnp.float32)
    e = jnp.maximum(e + b_emb_ref[...], 0.0).astype(cd)         # emb_block ReLU

    # torch.cat([e1, e2], dim=1) @ W_out == e1 @ W_out[:E] + e2 @ W_out[E:]
    # (weights pre-split in the wrapper -> no in-kernel weight slicing; the e
    #  row slices are at sublane-aligned boundaries).
    o = (jnp.dot(e[:tb], w_out1_ref[...], preferred_element_type=jnp.float32)
         + jnp.dot(e[tb:], w_out2_ref[...], preferred_element_type=jnp.float32)
         + b_out_ref[...])
    o = jnp.maximum(o, 0.0)                                      # out_block ReLU

    # nn.LayerNorm(out_size): biased variance, eps=1e-5, affine — all in f32.
    mean = jnp.mean(o, axis=-1, keepdims=True)
    var = jnp.mean((o - mean) ** 2, axis=-1, keepdims=True)
    o = (o - mean) * jax.lax.rsqrt(var + 1e-5) * ln_g_ref[...] + ln_b_ref[...]

    # out_block_out1 (Linear) + out_block_out2 (Softmax over actions).
    # Padded logit columns carry a -1e30 bias so they softmax to exactly 0.
    logits = jnp.dot(o.astype(cd), w_o1_ref[...],
                     preferred_element_type=jnp.float32) + b_o1_ref[...]
    logits = logits - jnp.max(logits, axis=-1, keepdims=True)
    p = jnp.exp(logits)
    denom = jnp.sum(p, axis=-1, keepdims=True)
    if jnp.dtype(compute_dtype) == jnp.dtype(jnp.float32):
        out_ref[...] = p / denom                     # strict path: exact
    else:
        out_ref[...] = p * pl.reciprocal(denom, approx=True)   # EUP slot


def _round_up(x, m):
    return ((x + m - 1) // m) * m


def embedding_network_forward(x1, x2, params, *, tile_b=2048,
                              compute_dtype=jnp.bfloat16):
    """Full _EmbeddingNetwork forward in a single batch-tiled Pallas kernel."""
    batch, obs = x1.shape
    hidden = params["w_in"].shape[1]
    emb = params["w_emb"].shape[1]
    out_dim = params["w_out"].shape[1]
    n_actions = params["w_o1"].shape[1]
    cd = compute_dtype

    # ---- batch tiling ------------------------------------------------------
    # Tiny batches: one full-extent tile (block dims == array dims is legal).
    # Otherwise sublane-aligned tiles, always >=2 so v7x megacore gets both TCs.
    if batch <= 16:
        tb, n_tiles = batch, 1
    else:
        n_tiles = max(2, pl.cdiv(batch, tile_b))
        tb = _round_up(pl.cdiv(batch, n_tiles), 8)
        n_tiles = pl.cdiv(batch, tb)
    b_pad = tb * n_tiles
    if b_pad != batch:
        pad = ((0, b_pad - batch), (0, 0))
        x1 = jnp.pad(x1, pad)
        x2 = jnp.pad(x2, pad)

    # ---- parameter prep (tiny, weight-sized ops) ---------------------------
    # Matmul weights pre-cast to compute dtype (halves resident VMEM + DMA and
    # removes per-tile casts); biases/LN params stay f32 (added on f32 accs).
    w_in = params["w_in"].astype(cd)
    w_emb = params["w_emb"].astype(cd)
    w_out1 = params["w_out"][:emb].astype(cd)    # split -> no in-kernel slice
    w_out2 = params["w_out"][emb:].astype(cd)
    b_in, b_emb, b_out = params["b_in"], params["b_emb"], params["b_out"]
    ln_g, ln_b = params["ln_g"], params["ln_b"]

    # Lane-pad the action dim to a multiple of 128 so the HBM output store is
    # lane-dense (unmasked vst). Padded columns softmax to 0 via -1e30 bias.
    act_pad = max(128, _round_up(n_actions, 128))
    w_o1 = params["w_o1"].astype(cd)
    b_o1 = params["b_o1"]
    if act_pad != n_actions:
        w_o1 = jnp.pad(w_o1, ((0, 0), (0, act_pad - n_actions)))
        b_o1 = jnp.pad(b_o1, ((0, 0), (0, act_pad - n_actions)),
                       constant_values=-1e30)

    weight_args = (w_in, b_in, w_emb, b_emb, w_out1, w_out2, b_out,
                   ln_g, ln_b, w_o1, b_o1)
    # Constant index_map -> each weight is DMA'd once and stays VMEM-resident.
    # NOTE: on v7x with production-size weights, add pipeline_mode=pl.Buffered(1)
    # to these specs to single-buffer the resident weights (blocks never change).
    weight_specs = [pl.BlockSpec(w.shape, lambda i: (0, 0)) for w in weight_args]
    act_spec = pl.BlockSpec((tb, obs), lambda i: (i, 0))

    # Generation-aware VMEM budget: ~96 MiB on v5e/v6e, ~48 MiB on v7x.
    try:
        vmem_cap = int(pltpu.get_tpu_info().vmem_capacity_bytes)
    except Exception:
        vmem_cap = 64 * 1024 * 1024
    vmem_limit = min(96 * 1024 * 1024, (vmem_cap * 3) // 4)

    flops = (2 * (2 * b_pad) * (obs * hidden + hidden * emb)
             + 2 * b_pad * (2 * emb * out_dim + out_dim * act_pad))
    transcendentals = b_pad * (act_pad + 2)       # exp per logit + rsqrt + rcp
    bytes_accessed = (2 * b_pad * obs * 4 + b_pad * act_pad * 4
                      + sum(int(w.size) * w.dtype.itemsize for w in weight_args))

    kernel = functools.partial(_embedding_net_kernel, compute_dtype=cd)
    out = pl.pallas_call(
        kernel,
        out_shape=jax.ShapeDtypeStruct((b_pad, act_pad), jnp.float32),
        grid=(n_tiles,),
        in_specs=[act_spec, act_spec] + weight_specs,
        out_specs=pl.BlockSpec((tb, act_pad), lambda i: (i, 0)),
        compiler_params=pltpu.CompilerParams(
            dimension_semantics=("parallel",),     # v7x: shard tiles over 2 TCs
            vmem_limit_bytes=int(vmem_limit)),
        cost_estimate=pl.CostEstimate(
            flops=int(flops),
            transcendentals=int(transcendentals),
            bytes_accessed=int(bytes_accessed)),
    )(x1, x2, *weight_args)
    return out[:batch, :n_actions]


def init_params(key, obs_dim, hidden_dim, emb_dim, out_dim, n_actions):
    """Deterministic synthetic parameters (shapes follow the torch module)."""
    keys = jax.random.split(key, 8)

    def lin(kw, kb, fan_in, fan_out):
        bound = 1.0 / jnp.sqrt(fan_in)
        w = jax.random.uniform(kw, (fan_in, fan_out), jnp.float32, -bound, bound)
        b = jax.random.uniform(kb, (1, fan_out), jnp.float32, -bound, bound)
        return w, b

    w_in, b_in = lin(keys[0], keys[1], obs_dim, hidden_dim)          # in_block
    w_emb, b_emb = lin(keys[2], keys[3], hidden_dim, emb_dim)        # emb_block
    w_out, b_out = lin(keys[4], keys[5], 2 * emb_dim, out_dim)       # out_block
    w_o1, b_o1 = lin(keys[6], keys[7], out_dim, n_actions)           # out1
    ln_g = jnp.ones((1, out_dim), jnp.float32)                       # LN gamma
    ln_b = jnp.zeros((1, out_dim), jnp.float32)                      # LN beta
    return {
        "w_in": w_in, "b_in": b_in,
        "w_emb": w_emb, "b_emb": b_emb,
        "w_out": w_out, "b_out": b_out,
        "ln_g": ln_g, "ln_b": ln_b,
        "w_o1": w_o1, "b_o1": b_o1,
    }


def _reference_forward(x1, x2, p):
    """Pure-JAX reference (mirrors the torch forward) for correctness checks."""
    def block(x):
        h = jnp.maximum(x @ p["w_in"] + p["b_in"], 0.0)
        return jnp.maximum(h @ p["w_emb"] + p["b_emb"], 0.0)

    cat = jnp.concatenate([block(x1), block(x2)], axis=1)
    o = jnp.maximum(cat @ p["w_out"] + p["b_out"], 0.0)
    mean = jnp.mean(o, axis=-1, keepdims=True)
    var = jnp.mean((o - mean) ** 2, axis=-1, keepdims=True)
    o = (o - mean) / jnp.sqrt(var + 1e-5) * p["ln_g"] + p["ln_b"]
    logits = o @ p["w_o1"] + p["b_o1"]
    return jax.nn.softmax(logits, axis=1)


if __name__ == "__main__":
    # Small shapes consistent with the module: batch=2, obs=16 features,
    # hidden=32, episodic emb=32, episodic out=64, 4 discrete actions.
    BATCH, OBS, HIDDEN, EMB, OUT, ACT = 2, 16, 32, 32, 64, 4

    key = jax.random.PRNGKey(0)
    k_p, k_x1, k_x2, k_y1, k_y2 = jax.random.split(key, 5)
    params = init_params(k_p, OBS, HIDDEN, EMB, OUT, ACT)

    # The torch forward takes x = (state, next_state).
    x1 = jax.random.normal(k_x1, (BATCH, OBS), jnp.float32)
    x2 = jax.random.normal(k_x2, (BATCH, OBS), jnp.float32)
    ref = _reference_forward(x1, x2, params)

    # Default path: bf16 MXU operands, f32 accumulation / elementwise.
    out = jax.block_until_ready(embedding_network_forward(x1, x2, params))
    assert out.shape == (BATCH, ACT)
    assert jnp.allclose(out, ref, atol=3e-2, rtol=3e-2)
    assert jnp.allclose(jnp.sum(out, axis=1), jnp.ones((BATCH,)), atol=1e-2)

    # Strict f32 path (exact softmax division, f32 matmuls).
    out_f32 = jax.block_until_ready(
        embedding_network_forward(x1, x2, params, compute_dtype=jnp.float32))
    assert jnp.allclose(out_f32, ref, atol=5e-3, rtol=5e-3)

    # Multi-tile grid path: batch 300 with small tiles -> 3 x 104-row tiles.
    B2 = 300
    y1 = jax.random.normal(k_y1, (B2, OBS), jnp.float32)
    y2 = jax.random.normal(k_y2, (B2, OBS), jnp.float32)
    out2 = jax.block_until_ready(
        embedding_network_forward(y1, y2, params, tile_b=128))
    ref2 = _reference_forward(y1, y2, params)
    assert out2.shape == (B2, ACT)
    assert jnp.allclose(out2, ref2, atol=3e-2, rtol=3e-2)

    print("KERNEL_OK")
</pallas_src>

<mosaic_0001>
module attributes {stable_mosaic.version = 11 : i64} {
  func.func @_embedding_net_kernel(%arg0: i32, %arg1: memref<2x16xf32, #tpu.memory_space<vmem>>, %arg2: memref<2x16xf32, #tpu.memory_space<vmem>>, %arg3: memref<16x32xbf16, #tpu.memory_space<vmem>>, %arg4: memref<1x32xf32, #tpu.memory_space<vmem>>, %arg5: memref<32x32xbf16, #tpu.memory_space<vmem>>, %arg6: memref<1x32xf32, #tpu.memory_space<vmem>>, %arg7: memref<32x64xbf16, #tpu.memory_space<vmem>>, %arg8: memref<32x64xbf16, #tpu.memory_space<vmem>>, %arg9: memref<1x64xf32, #tpu.memory_space<vmem>>, %arg10: memref<1x64xf32, #tpu.memory_space<vmem>>, %arg11: memref<1x64xf32, #tpu.memory_space<vmem>>, %arg12: memref<64x128xbf16, #tpu.memory_space<vmem>>, %arg13: memref<1x128xf32, #tpu.memory_space<vmem>>, %arg14: memref<2x128xf32, #tpu.memory_space<vmem>>) attributes {dimension_semantics = [#tpu.dimension_semantics<parallel>], iteration_bounds = array<i64: 1>, scalar_prefetch = 0 : i64, scratch_operands = 0 : i64, tpu.core_type = #tpu.core_type<tc>, window_params = [{transform_indices = @transform_0, window_bounds = array<i64: 2, 16>}, {transform_indices = @transform_1, window_bounds = array<i64: 2, 16>}, {pipeline_mode = #tpu.pipeline_mode<synchronous>, transform_indices = @transform_2, window_bounds = array<i64: 16, 32>}, {pipeline_mode = #tpu.pipeline_mode<synchronous>, transform_indices = @transform_3, window_bounds = array<i64: 1, 32>}, {pipeline_mode = #tpu.pipeline_mode<synchronous>, transform_indices = @transform_4, window_bounds = array<i64: 32, 32>}, {pipeline_mode = #tpu.pipeline_mode<synchronous>, transform_indices = @transform_5, window_bounds = array<i64: 1, 32>}, {pipeline_mode = #tpu.pipeline_mode<synchronous>, transform_indices = @transform_6, window_bounds = array<i64: 32, 64>}, {pipeline_mode = #tpu.pipeline_mode<synchronous>, transform_indices = @transform_7, window_bounds = array<i64: 32, 64>}, {pipeline_mode = #tpu.pipeline_mode<synchronous>, transform_indices = @transform_8, window_bounds = array<i64: 1, 64>}, {pipeline_mode = #tpu.pipeline_mode<synchronous>, transform_indices = @transform_9, window_bounds = array<i64: 1, 64>}, {pipeline_mode = #tpu.pipeline_mode<synchronous>, transform_indices = @transform_10, window_bounds = array<i64: 1, 64>}, {pipeline_mode = #tpu.pipeline_mode<synchronous>, transform_indices = @transform_11, window_bounds = array<i64: 64, 128>}, {pipeline_mode = #tpu.pipeline_mode<synchronous>, transform_indices = @transform_12, window_bounds = array<i64: 1, 128>}, {transform_indices = @transform_13, window_bounds = array<i64: 2, 128>}]} {
    %c0 = arith.constant 0 : index
    %c0_0 = arith.constant 0 : index
    %0 = vector.load %arg1[%c0, %c0_0] : memref<2x16xf32, #tpu.memory_space<vmem>>, vector<2x16xf32>
    %c0_1 = arith.constant 0 : index
    %c0_2 = arith.constant 0 : index
    %1 = vector.load %arg2[%c0_1, %c0_2] : memref<2x16xf32, #tpu.memory_space<vmem>>, vector<2x16xf32>
    %2 = tpu.concatenate %0, %1 in 0 : vector<2x16xf32>, vector<2x16xf32> -> vector<4x16xf32>
    %3 = arith.truncf %2 : vector<4x16xf32> to vector<4x16xbf16>
    %c0_3 = arith.constant 0 : index
    %c0_4 = arith.constant 0 : index
    %4 = vector.load %arg3[%c0_3, %c0_4] : memref<16x32xbf16, #tpu.memory_space<vmem>>, vector<16x32xbf16>
    %cst = arith.constant dense<0.000000e+00> : vector<4x32xf32>
    %5 = tpu.matmul %3, %4, %cst {dimension_numbers = #tpu.dot_dimension_numbers<[1], [0], [0], [1], [0, 0, 1, 1], [], []>} : vector<4x16xbf16>, vector<16x32xbf16>, vector<4x32xf32> -> vector<4x32xf32>
    %c0_5 = arith.constant 0 : index
    %c0_6 = arith.constant 0 : index
    %6 = vector.load %arg4[%c0_5, %c0_6] : memref<1x32xf32, #tpu.memory_space<vmem>>, vector<1x32xf32>
    %7 = vector.broadcast %6 : vector<1x32xf32> to vector<4x32xf32>
    %8 = arith.addf %5, %7 : vector<4x32xf32>
    %cst_7 = arith.constant 0.000000e+00 : f32
    %9 = vector.broadcast %cst_7 : f32 to vector<4x32xf32>
    %10 = arith.maximumf %8, %9 : vector<4x32xf32>
    %11 = arith.truncf %10 : vector<4x32xf32> to vector<4x32xbf16>
    %c0_8 = arith.constant 0 : index
    %c0_9 = arith.constant 0 : index
    %12 = vector.load %arg5[%c0_8, %c0_9] : memref<32x32xbf16, #tpu.memory_space<vmem>>, vector<32x32xbf16>
    %cst_10 = arith.constant dense<0.000000e+00> : vector<4x32xf32>
    %13 = tpu.matmul %11, %12, %cst_10 {dimension_numbers = #tpu.dot_dimension_numbers<[1], [0], [0], [1], [0, 0, 1, 1], [], []>} : vector<4x32xbf16>, vector<32x32xbf16>, vector<4x32xf32> -> vector<4x32xf32>
    %c0_11 = arith.constant 0 : index
    %c0_12 = arith.constant 0 : index
    %14 = vector.load %arg6[%c0_11, %c0_12] : memref<1x32xf32, #tpu.memory_space<vmem>>, vector<1x32xf32>
    %15 = vector.broadcast %14 : vector<1x32xf32> to vector<4x32xf32>
    %16 = arith.addf %13, %15 : vector<4x32xf32>
    %cst_13 = arith.constant 0.000000e+00 : f32
    %17 = vector.broadcast %cst_13 : f32 to vector<4x32xf32>
    %18 = arith.maximumf %16, %17 : vector<4x32xf32>
    %19 = arith.truncf %18 : vector<4x32xf32> to vector<4x32xbf16>
    %20 = vector.extract_strided_slice %19 {offsets = [0, 0], sizes = [2, 32], strides = [1, 1]} : vector<4x32xbf16> to vector<2x32xbf16>
    %c0_14 = arith.constant 0 : index
    %c0_15 = arith.constant 0 : index
    %21 = vector.load %arg7[%c0_14, %c0_15] : memref<32x64xbf16, #tpu.memory_space<vmem>>, vector<32x64xbf16>
    %cst_16 = arith.constant dense<0.000000e+00> : vector<2x64xf32>
    %22 = tpu.matmul %20, %21, %cst_16 {dimension_numbers = #tpu.dot_dimension_numbers<[1], [0], [0], [1], [0, 0, 1, 1], [], []>} : vector<2x32xbf16>, vector<32x64xbf16>, vector<2x64xf32> -> vector<2x64xf32>
    %23 = vector.extract_strided_slice %19 {offsets = [2, 0], sizes = [2, 32], strides = [1, 1]} : vector<4x32xbf16> to vector<2x32xbf16>
    %c0_17 = arith.constant 0 : index
    %c0_18 = arith.constant 0 : index
    %24 = vector.load %arg8[%c0_17, %c0_18] : memref<32x64xbf16, #tpu.memory_space<vmem>>, vector<32x64xbf16>
    %cst_19 = arith.constant dense<0.000000e+00> : vector<2x64xf32>
    %25 = tpu.matmul %23, %24, %cst_19 {dimension_numbers = #tpu.dot_dimension_numbers<[1], [0], [0], [1], [0, 0, 1, 1], [], []>} : vector<2x32xbf16>, vector<32x64xbf16>, vector<2x64xf32> -> vector<2x64xf32>
    %26 = arith.addf %22, %25 : vector<2x64xf32>
    %c0_20 = arith.constant 0 : index
    %c0_21 = arith.constant 0 : index
    %27 = vector.load %arg9[%c0_20, %c0_21] : memref<1x64xf32, #tpu.memory_space<vmem>>, vector<1x64xf32>
    %28 = vector.broadcast %27 : vector<1x64xf32> to vector<2x64xf32>
    %29 = arith.addf %26, %28 : vector<2x64xf32>
    %cst_22 = arith.constant 0.000000e+00 : f32
    %30 = vector.broadcast %cst_22 : f32 to vector<2x64xf32>
    %31 = arith.maximumf %29, %30 : vector<2x64xf32>
    %cst_23 = arith.constant dense<0.000000e+00> : vector<2xf32>
    %32 = vector.multi_reduction <add>, %31, %cst_23 [1] : vector<2x64xf32> to vector<2xf32>
    %33 = vector.shape_cast %32 : vector<2xf32> to vector<2x1xf32>
    %cst_24 = arith.constant 6.400000e+01 : f32
    %34 = vector.broadcast %cst_24 : f32 to vector<2x1xf32>
    %35 = arith.divf %33, %34 : vector<2x1xf32>
    %36 = vector.broadcast %35 : vector<2x1xf32> to vector<2x64xf32>
    %37 = arith.subf %31, %36 : vector<2x64xf32>
    %38 = arith.mulf %37, %37 : vector<2x64xf32>
    %cst_25 = arith.constant dense<0.000000e+00> : vector<2xf32>
    %39 = vector.multi_reduction <add>, %38, %cst_25 [1] : vector<2x64xf32> to vector<2xf32>
    %40 = vector.shape_cast %39 : vector<2xf32> to vector<2x1xf32>
    %cst_26 = arith.constant 6.400000e+01 : f32
    %41 = vector.broadcast %cst_26 : f32 to vector<2x1xf32>
    %42 = arith.divf %40, %41 : vector<2x1xf32>
    %43 = vector.broadcast %35 : vector<2x1xf32> to vector<2x64xf32>
    %44 = arith.subf %31, %43 : vector<2x64xf32>
    %cst_27 = arith.constant 9.99999974E-6 : f32
    %45 = vector.broadcast %cst_27 : f32 to vector<2x1xf32>
    %46 = arith.addf %42, %45 : vector<2x1xf32>
    %47 = math.rsqrt %46 : vector<2x1xf32>
    %48 = vector.broadcast %47 : vector<2x1xf32> to vector<2x64xf32>
    %49 = arith.mulf %44, %48 : vector<2x64xf32>
    %c0_28 = arith.constant 0 : index
    %c0_29 = arith.constant 0 : index
    %50 = vector.load %arg10[%c0_28, %c0_29] : memref<1x64xf32, #tpu.memory_space<vmem>>, vector<1x64xf32>
    %51 = vector.broadcast %50 : vector<1x64xf32> to vector<2x64xf32>
    %52 = arith.mulf %49, %51 : vector<2x64xf32>
    %c0_30 = arith.constant 0 : index
    %c0_31 = arith.constant 0 : index
    %53 = vector.load %arg11[%c0_30, %c0_31] : memref<1x64xf32, #tpu.memory_space<vmem>>, vector<1x64xf32>
    %54 = vector.broadcast %53 : vector<1x64xf32> to vector<2x64xf32>
    %55 = arith.addf %52, %54 : vector<2x64xf32>
    %56 = arith.truncf %55 : vector<2x64xf32> to vector<2x64xbf16>
    %c0_32 = arith.constant 0 : index
    %c0_33 = arith.constant 0 : index
    %57 = vector.load %arg12[%c0_32, %c0_33] : memref<64x128xbf16, #tpu.memory_space<vmem>>, vector<64x128xbf16>
    %cst_34 = arith.constant dense<0.000000e+00> : vector<2x128xf32>
    %58 = tpu.matmul %56, %57, %cst_34 {dimension_numbers = #tpu.dot_dimension_numbers<[1], [0], [0], [1], [0, 0, 1, 1], [], []>} : vector<2x64xbf16>, vector<64x128xbf16>, vector<2x128xf32> -> vector<2x128xf32>
    %c0_35 = arith.constant 0 : index
    %c0_36 = arith.constant 0 : index
    %59 = vector.load %arg13[%c0_35, %c0_36] : memref<1x128xf32, #tpu.memory_space<vmem>>, vector<1x128xf32>
    %60 = vector.broadcast %59 : vector<1x128xf32> to vector<2x128xf32>
    %61 = arith.addf %58, %60 : vector<2x128xf32>
    %cst_37 = arith.constant dense<0xFF800000> : vector<2xf32>
    %62 = vector.multi_reduction <maximumf>, %61, %cst_37 [1] : vector<2x128xf32> to vector<2xf32>
    %63 = vector.shape_cast %62 : vector<2xf32> to vector<2x1xf32>
    %64 = vector.broadcast %63 : vector<2x1xf32> to vector<2x128xf32>
    %65 = arith.subf %61, %64 : vector<2x128xf32>
    %66 = math.exp %65 : vector<2x128xf32>
    %cst_38 = arith.constant dense<0.000000e+00> : vector<2xf32>
    %67 = vector.multi_reduction <add>, %66, %cst_38 [1] : vector<2x128xf32> to vector<2xf32>
    %68 = vector.shape_cast %67 : vector<2xf32> to vector<2x1xf32>
    %69 = tpu.reciprocal %68 {approx = true} : vector<2x1xf32> -> vector<2x1xf32>
    %70 = vector.broadcast %69 : vector<2x1xf32> to vector<2x128xf32>
    %71 = arith.mulf %66, %70 : vector<2x128xf32>
    %c0_39 = arith.constant 0 : index
    %c0_40 = arith.constant 0 : index
    %72 = vector.load %arg14[%c0_39, %c0_40] : memref<2x128xf32, #tpu.memory_space<vmem>>, vector<2x128xf32>
    tpu.vector_store %arg14[%c0_39, %c0_40], %71 {strides = array<i32>} : memref<2x128xf32, #tpu.memory_space<vmem>>, vector<2x128xf32>,
    return
  }
  func.func @transform_0(%arg0: i32) -> (i32, i32) {
    %c0_i32 = arith.constant 0 : i32
    %c0_i32_0 = arith.constant 0 : i32
    return %arg0, %c0_i32 : i32, i32
  }
  func.func @transform_1(%arg0: i32) -> (i32, i32) {
    %c0_i32 = arith.constant 0 : i32
    %c0_i32_0 = arith.constant 0 : i32
    return %arg0, %c0_i32 : i32, i32
  }
  func.func @transform_2(%arg0: i32) -> (i32, i32) {
    %c0_i32 = arith.constant 0 : i32
    %c0_i32_0 = arith.constant 0 : i32
    %c0_i32_1 = arith.constant 0 : i32
    return %c0_i32, %c0_i32_0 : i32, i32
  }
  func.func @transform_3(%arg0: i32) -> (i32, i32) {
    %c0_i32 = arith.constant 0 : i32
    %c0_i32_0 = arith.constant 0 : i32
    %c0_i32_1 = arith.constant 0 : i32
    return %c0_i32, %c0_i32_0 : i32, i32
  }
  func.func @transform_4(%arg0: i32) -> (i32, i32) {
    %c0_i32 = arith.constant 0 : i32
    %c0_i32_0 = arith.constant 0 : i32
    %c0_i32_1 = arith.constant 0 : i32
    return %c0_i32, %c0_i32_0 : i32, i32
  }
  func.func @transform_5(%arg0: i32) -> (i32, i32) {
    %c0_i32 = arith.constant 0 : i32
    %c0_i32_0 = arith.constant 0 : i32
    %c0_i32_1 = arith.constant 0 : i32
    return %c0_i32, %c0_i32_0 : i32, i32
  }
  func.func @transform_6(%arg0: i32) -> (i32, i32) {
    %c0_i32 = arith.constant 0 : i32
    %c0_i32_0 = arith.constant 0 : i32
    %c0_i32_1 = arith.constant 0 : i32
    return %c0_i32, %c0_i32_0 : i32, i32
  }
  func.func @transform_7(%arg0: i32) -> (i32, i32) {
    %c0_i32 = arith.constant 0 : i32
    %c0_i32_0 = arith.constant 0 : i32
    %c0_i32_1 = arith.constant 0 : i32
    return %c0_i32, %c0_i32_0 : i32, i32
  }
  func.func @transform_8(%arg0: i32) -> (i32, i32) {
    %c0_i32 = arith.constant 0 : i32
    %c0_i32_0 = arith.constant 0 : i32
    %c0_i32_1 = arith.constant 0 : i32
    return %c0_i32, %c0_i32_0 : i32, i32
  }
  func.func @transform_9(%arg0: i32) -> (i32, i32) {
    %c0_i32 = arith.constant 0 : i32
    %c0_i32_0 = arith.constant 0 : i32
    %c0_i32_1 = arith.constant 0 : i32
    return %c0_i32, %c0_i32_0 : i32, i32
  }
  func.func @transform_10(%arg0: i32) -> (i32, i32) {
    %c0_i32 = arith.constant 0 : i32
    %c0_i32_0 = arith.constant 0 : i32
    %c0_i32_1 = arith.constant 0 : i32
    return %c0_i32, %c0_i32_0 : i32, i32
  }
  func.func @transform_11(%arg0: i32) -> (i32, i32) {
    %c0_i32 = arith.constant 0 : i32
    %c0_i32_0 = arith.constant 0 : i32
    %c0_i32_1 = arith.constant 0 : i32
    return %c0_i32, %c0_i32_0 : i32, i32
  }
  func.func @transform_12(%arg0: i32) -> (i32, i32) {
    %c0_i32 = arith.constant 0 : i32
    %c0_i32_0 = arith.constant 0 : i32
    %c0_i32_1 = arith.constant 0 : i32
    return %c0_i32, %c0_i32_0 : i32, i32
  }
  func.func @transform_13(%arg0: i32) -> (i32, i32) {
    %c0_i32 = arith.constant 0 : i32
    %c0_i32_0 = arith.constant 0 : i32
    return %arg0, %c0_i32 : i32, i32
  }
}

</mosaic_0001>

<bundles_post_ra>
// kernel: tpu_custom_call.1
= control target key start
LH: loop header
LB: loop body
LE: loop exit
PB: predicated region body
PF: predicated region fallthrough
CT: control target
= control target key end

     0   :  { %18 = vsyncpa [#allocation3], 0  ;;  %s862_s0 = inlined_call_operand.hbm [shape: f32[2,16], index: 0, kind: input, shape index: {}]   ;;  %s863_s1 = inlined_call_operand.hbm [shape: f32[2,16], index: 1, kind: input, shape index: {}]   ;;  %s864_s2 = inlined_call_operand.hbm [shape: bf16[16,32], index: 2, kind: input, shape index: {}]   ;;  %s865_s3 = inlined_call_operand.vmem [shape: f32[1,32], index: 3, kind: input, shape index: {}]   ;;  %s866_s4 = inlined_call_operand.hbm [shape: bf16[32,32], index: 4, kind: input, shape index: {}]   ;;  %s867_s5 = inlined_call_operand.vmem [shape: f32[1,32], index: 5, kind: input, shape index: {}]   ;;  %s868_s6 = inlined_call_operand.hbm [shape: bf16[32,64], index: 6, kind: input, shape index: {}]   ;;  %s869_s7 = inlined_call_operand.hbm [shape: bf16[32,64], index: 7, kind: input, shape index: {}]   ;;  %s870_s8 = inlined_call_operand.vmem [shape: f32[1,64], index: 8, kind: input, shape index: {}]   ;;  %s871_s9 = inlined_call_operand.vmem [shape: f32[1,64], index: 9, kind: input, shape index: {}]   ;;  %s872_s10 = inlined_call_operand.vmem [shape: f32[1,64], index: 10, kind: input, shape index: {}]   ;;  %s873_s11 = inlined_call_operand.hbm [shape: bf16[64,128], index: 11, kind: input, shape index: {}]   ;;  %s874_s12 = inlined_call_operand.vmem [shape: f32[1,128], index: 12, kind: input, shape index: {}]   ;;  %s875_s13 = inlined_call_operand.hbm [shape: f32[2,128], index: 13, kind: output, shape index: {}]  }
   0x1   :  { %19 = vsyncpa [#allocation6], 0 }
   0x2   :  { %20 = vsyncpa [#allocation9], 0 }
   0x3   :  { %21 = vsyncpa [#allocation12], 0  ;;  %s39_s27 = sshll.u32 %s863_s1, 4  ;;  %s40_s27 = int_to_ptr.hbm [resolvable:$true] %s39_s27 }
   0x4   :  { %22 = vsyncpa [#allocation4], 0  ;;  %s716_s28 = smov [#allocation5]   ;;  %s64_s15 = sshll.u32 %s866_s4, 4  ;;  %s65_s15 = int_to_ptr.hbm [resolvable:$true] %s64_s15 }
   0x5   :  { %s41_s29 = sshll.u32 %s716_s28, 4  ;;  %s717_s16 = smov [#allocation8]   ;;  %s42_s29 = int_to_ptr.vmem [resolvable:$true] %s41_s29 }
   0x6   :  { %44 = dma.hbm_to_vmem [thread:$0]  %s40_s27, 32, %s42_s29, [#allocation6]  }
   0x7   :  { %s66_s17 = sshll.u32 %s717_s16, 4  ;;  %s92_s20 = sshll.u32 %s869_s7, 4  ;;  %s67_s17 = int_to_ptr.vmem [resolvable:$true] %s66_s17  ;;  %s93_s20 = int_to_ptr.hbm [resolvable:$true] %s92_s20 }
   0x8   :  { %s718_s1 = smov 64   ;;  %s719_s21 = smov 4  }
   0x9   :  { %72 = dma.hbm_to_vmem [thread:$0]  %s65_s15, 256, %s67_s17, [#allocation9], %s718_s1, %s718_s1, %s719_s21  }
   0xa   :  { %s28_s24 = sshll.u32 %s862_s0, 4  ;;  %s720_s4 = smov [#allocation11]   ;;  %s29_s24 = int_to_ptr.hbm [resolvable:$true] %s28_s24 }
   0xb   :  { %s94_s25 = sshll.u32 %s720_s4, 4  ;;  %s721_s7 = smov [#allocation2]   ;;  %s95_s25 = int_to_ptr.vmem [resolvable:$true] %s94_s25 }
   0xc   :  { %100 = dma.hbm_to_vmem [thread:$0]  %s93_s20, 256, %s95_s25, [#allocation12], %s718_s1, %s718_s1, %s719_s21  }
   0xd   :  { %s30_s26 = sshll.u32 %s721_s7, 4  ;;  %s49_s29 = sshll.u32 %s864_s2, 4  ;;  %s31_s26 = int_to_ptr.vmem [resolvable:$true] %s30_s26  ;;  %s50_s29 = int_to_ptr.hbm [resolvable:$true] %s49_s29 }
   0xe   :  { %33 = dma.hbm_to_vmem [thread:$0]  %s29_s24, 32, %s31_s26, [#allocation3]  }
   0xf   :  { %s79_s0 = sshll.u32 %s868_s6, 4  ;;  %s722_s15 = smov [#allocation7]   ;;  %s80_s0 = int_to_ptr.hbm [resolvable:$true] %s79_s0 }
  0x10   :  { %s51_s16 = sshll.u32 %s722_s15, 4  ;;  %s723_s17 = smov [#allocation10]   ;;  %s52_s16 = int_to_ptr.vmem [resolvable:$true] %s51_s16 }
  0x11   :  { %57 = dma.hbm_to_vmem [thread:$0]  %s50_s29, 128, %s52_s16, [#allocation6], %s718_s1, %s718_s1, %s719_s21  }
  0x12   :  { %s81_s18 = sshll.u32 %s723_s17, 4  ;;  %s111_s2 = sshll.u32 %s873_s11, 4  ;;  %s82_s18 = int_to_ptr.vmem [resolvable:$true] %s81_s18  ;;  %s112_s2 = int_to_ptr.hbm [resolvable:$true] %s111_s2 }
  0x13   :  { %87 = dma.hbm_to_vmem [thread:$0]  %s80_s0, 256, %s82_s18, [#allocation9], %s718_s1, %s718_s1, %s719_s21  }
  0x14   :  { %s724_s6 = smov [#allocation13]  }
  0x15   :  { %s113_s22 = sshll.u32 %s724_s6, 4  ;;  %s114_s22 = int_to_ptr.vmem [resolvable:$true] %s113_s22 }
  0x16   :  { %119 = dma.hbm_to_vmem [thread:$0]  %s112_s2, 512, %s114_s22, [#allocation12], %s718_s1, %s718_s1, %s719_s21  }
  0x17   :  { %706 = dma.done.wait [#allocation3], 32  }
  0x18   :  { %707 = vsyncadd [#allocation3], 4294967264 }
  0x19   :  { %708 = dma.done.wait [#allocation6], 160  }
  0x1a   :  { %709 = vsyncadd [#allocation6], 4294967136 }
  0x1b   :  { %710 = dma.done.wait [#allocation9], 512  }
  0x1c   :  { %711 = vsyncadd [#allocation9], 4294966784 }
  0x1d   :  { %712 = dma.done.wait [#allocation12], 768  }
  0x1e   :  { %713 = vsyncadd [#allocation12], 4294966528  ;;  %v478_v0 = vld [vmem:[#allocation7] sm:$0xff]  ;;  %v151_v1 = vld [vmem:[#allocation2] sm:$0x3]  ;;  %vm156_vm0 = vcmask 1041408  }
  0x1f   :  { %v152_v2 = vld [vmem:[#allocation5] sm:$0x3]  ;;  %182 = vmatpush.bf16.msra.mxu0 %v478_v0  ;;  %vm171_vm1 = vcmask 130048   ;;  %v480_v6 = vld [vmem:[#allocation8 + $0x8] sm:$0xff]  ;;  %v479_v7 = vld [vmem:[#allocation8] sm:$0xff]  ;;  %vm210_vm2 = vcmask 261120  }
  0x20   :  { %v154_v3 = vrot.slane %v152_v2, 6  ;;  %220 = vmatpush.bf16.msra.mxu1 %v480_v6  ;;  %v500_v8 = vld [vmem:[%s865_s3] ss:$0 sm:$0xff]  ;;  %v482_v14 = vld [vmem:[#allocation10 + $0x8] sm:$0xff]  ;;  %v484_v16 = vld [vmem:[#allocation11 + $0x8] sm:$0xff]  ;;  %vm303_vm3 = vcmask 517120  }
  0x21   :  { %290 = vmatpush.bf16.msra.mxu3 %v482_v14  ;;  %v481_v15 = vld [vmem:[#allocation10] sm:$0xff]  ;;  %262 = vmatpush.bf16.msra.mxu2 %v484_v16  ;;  %v483_v17 = vld [vmem:[#allocation11] sm:$0xff]  ;;  %v725_v36 = vmov 64.0   ;;  %v488_v48 = vld [vmem:[#allocation13 + $0x18] sm:$0xff]  ;;  %vm380_vm8 = vcmask 523264   ;;  %s416_s28 = sshll.u32 %s875_s13, 4  ;;  %s417_s28 = int_to_ptr.hbm [resolvable:$true] %s416_s28 }
  0x22   :  { %v157_v4 = vsel %vm156_vm0, %v151_v1, %v154_v3  ;;  %v501_v18 = vld [vmem:[%s867_s5] ss:$0 sm:$0xff]  ;;  %506 = vrcp.f32 %v725_v36  ;;  %v487_v49 = vld [vmem:[#allocation13 + $0x10] sm:$0xff]  ;;  %v486_v50 = vld [vmem:[#allocation13 + $0x8] sm:$0xff] }
  0x23   :  { %v158_v5 = vpack.c.bf16 %v157_v4, %v157_v4  ;;  %v502_v28 = vld [vmem:[%s870_s8] ss:$0 sm:$0xff]  ;;  %388 = vmatpush.bf16.msrb.mxu0 %v488_v48 }
  0x24   :  { %221 = vmatpush.bf16.msra.mxu1 %v479_v7  ;;  %v485_v51 = vld [vmem:[#allocation13] sm:$0xff] }
  0x25   :  { %433 = vmatmul.msk.bf16.vlgmr.msra.gmra.mxu0 %vm171_vm1, %v158_v5  ;;  %291 = vmatpush.bf16.msra.mxu3 %v481_v15  ;;  %v503_v61 = vld [vmem:[%s871_s9] ss:$0 sm:$0xff]  ;;  %s726_s9 = smov [#allocation14]  }
  0x26   :  { %263 = vmatpush.bf16.msra.mxu2 %v483_v17  ;;  %v504_v0 = vld [vmem:[%s872_s10] ss:$0 sm:$0xff]  ;;  %s414_s10 = sshll.u32 %s726_s9, 4  ;;  %s415_s10 = int_to_ptr.vmem [resolvable:$true] %s414_s10 }
  0x27   :  { %389 = vmatpush.bf16.msrb.mxu0 %v487_v49  ;;  %v505_v4 = vld [vmem:[%s874_s12] ss:$0 sm:$0xff] }
  0x28   :  { %v507_v37 = vpop.eup %506 }
  0x29   :  { %v308_v38 = vmul.f32 64.0, %v507_v37  ;;  %vm312_vm4 = vweird.f32 %v507_v37 }
  0x2b   :  { %v309_v39 = vsub.f32 1.0, %v308_v38  ;;  %390 = vmatpush.bf16.msrb.mxu0 %v486_v50 }
  0x2d   :  { %v310_v40 = vmul.f32 %v507_v37, %v309_v39 }
  0x2f   :  { %v311_v41 = vadd.f32 %v507_v37, %v310_v40  ;;  %391 = vmatpush.bf16.msrb.mxu0 %v485_v51 }
  0x31   :  { %v313_v42 = vsel %vm312_vm4, %v507_v37, %v311_v41 }
  0xa2   :  { %v184_v9 = vpop.f32.mrf.mxu0 }
  0xa3   :  { %v185_v10 = vadd.f32 %v500_v8, %v184_v9 }
  0xa5   :  { %v188_v11 = vmax.f32 %v185_v10, 0.0 }
  0xa7   :  { %v189_v12 = vpack.c.bf16 %v188_v11, %v188_v11 }
  0xa9   :  { %442 = vmatmul.msk.bf16.vlgmr.msra.gmra.mxu1 %vm210_vm2, %v189_v12 }
  0xaa   :  { %v186_v13 = vpop.f32.mrf.mxu0 }
 0x126   :  { %v223_v19 = vpop.f32.mrf.mxu1 }
 0x127   :  { %v224_v20 = vadd.f32 %v501_v18, %v223_v19 }
 0x129   :  { %v227_v21 = vmax.f32 %v224_v20, 0.0 }
 0x12b   :  { %v228_v22 = vpack.c.bf16 %v227_v21, %v227_v21 }
 0x12d   :  { %v238_v23 = vunpack.c.l.b16 %v228_v22  ;;  %460 = vmatmul.msk.bf16.vlgmr.msra.gmra.mxu3 %vm210_vm2, %v228_v22 }
 0x12e   :  { %v225_v24 = vpop.f32.mrf.mxu1 }
 0x12f   :  { %v239_v25 = vpack.c.b16 %v238_v23, %v238_v23 }
 0x131   :  { %v240_v26 = vrot.slane %v239_v25, 1 }
 0x133   :  { %451 = vmatmul.msk.bf16.vlgmr.msra.gmra.mxu2 %vm210_vm2, %v240_v26 }
 0x1b0   :  { %v293_v27 = vpop.f32.mrf.mxu3 }
 0x1b6   :  { %v265_v29 = vpop.f32.mrf.mxu2 }
 0x1b7   :  { %v294_v30 = vadd.f32 %v293_v27, %v265_v29 }
 0x1b8   :  { %v295_v31 = vpop.f32.mrf.mxu3 }
 0x1b9   :  { %v301_v32 = vadd.f32 %v502_v28, %v294_v30 }
 0x1bb   :  { %v302_v33 = vmax.f32 %v301_v32, 0.0 }
 0x1bd   :  { %v304_v34 = vsel %vm303_vm3, %v302_v33, 0.0 }
 0x1be   :  { %305 = vadd.xlane.f32.xlu0 %v304_v34  ;;  %v267_v35 = vpop.f32.mrf.mxu2 }
 0x231   :  { %v306_v43 = vpop.xlane.xlu0 %305 }
 0x232   :  { %v314_v44 = vmul.f32 %v313_v42, %v306_v43 }
 0x234   :  { %v315_v45 = vsub.f32 %v302_v33, %v314_v44 }
 0x236   :  { %v316_v46 = vmul.f32 %v315_v45, %v315_v45 }
 0x238   :  { %v317_v47 = vsel %vm303_vm3, %v316_v46, 0.0 }
 0x239   :  { %318 = vadd.xlane.f32.xlu0 %v317_v47 }
 0x2ac   :  { %v319_v52 = vpop.xlane.xlu0 %318 }
 0x2ad   :  { %v320_v53 = vmul.f32 %v319_v52, %v313_v42 }
 0x2af   :  { %v321_v54 = vadd.f32 1e-05, %v320_v53 }
 0x2b1   :  { %508 = vrsqrt.f32 %v321_v54  ;;  %vm328_vm6 = vweird.f32 %v321_v54 }
 0x2b7   :  { %v509_v55 = vpop.eup %508 }
 0x2b8   :  { %v323_v56 = vmul.f32 %v509_v55, %v321_v54  ;;  %vm329_vm5 = vweird.f32 %v509_v55 }
 0x2b9   :  { %vm330_vm7 = vmor %vm328_vm6, %vm329_vm5 }
 0x2ba   :  { %v324_v57 = vmul.f32 %v509_v55, %v323_v56 }
 0x2bc   :  { %v325_v58 = vmul.f32 0.5, %v324_v57 }
 0x2be   :  { %v326_v59 = vsub.f32 1.5, %v325_v58 }
 0x2c0   :  { %v327_v60 = vmul.f32 %v509_v55, %v326_v59 }
 0x2c2   :  { %v331_v62 = vsel %vm330_vm7, %v509_v55, %v327_v60 }
 0x2c3   :  { %v332_v63 = vmul.f32 %v331_v62, %v315_v45 }
 0x2c5   :  { %v337_v1 = vmul.f32 %v503_v61, %v332_v63 }
 0x2c7   :  { %v342_v2 = vadd.f32 %v504_v0, %v337_v1 }
 0x2c9   :  { %v343_v3 = vpack.c.bf16 %v342_v2, %v342_v2 }
 0x2cb   :  { %477 = vmatmul.msk.bf16.vlgmr.msrb.gmra.mxu0 %vm380_vm8, %v343_v3 }
 0x348   :  { %v393_v5 = vpop.f32.mrf.mxu0 }
 0x349   :  { %v394_v6 = vadd.f32 %v505_v4, %v393_v5 }
 0x34b   :  { %v397_v7 = vsel %vm156_vm0, %v394_v6, -inf }
 0x34c   :  { %398 = vmax.xlane.f32.xlu1 %v397_v7 }
 0x350   :  { %v395_v8 = vpop.f32.mrf.mxu0 }
 0x3bf   :  { %v399_v9 = vpop.xlane.xlu1 %398 }
 0x3c0   :  { %v400_v10 = vsub.f32 %v394_v6, %v399_v9 }
 0x3c2   :  { %v401_v11 = vmul.f32 1.442695, %v400_v10 }
 0x3c4   :  { %510 = vpow2.f32 %v401_v11 }
 0x3ca   :  { %v511_v12 = vpop.eup %510 }
 0x3cb   :  { %v403_v13 = vsel %vm156_vm0, %v511_v12, 0.0 }
 0x3cc   :  { %404 = vadd.xlane.f32.xlu1 %v403_v13 }
 0x43f   :  { %v405_v14 = vpop.xlane.xlu1 %404 }
 0x440   :  { %512 = vrcp.f32 %v405_v14 }
 0x446   :  { %v513_v15 = vpop.eup %512 }
 0x447   :  { %v407_v16 = vmul.f32 %v513_v15, %v511_v12 }
 0x449   :  { %408 = vst [vmem:[#allocation14] sm:$0x3] %v407_v16 }
 0x44a   :  { %419 = dma.vmem_to_hbm [thread:$0]  %s415_s10, 32, %s417_s28, [#allocation4]  }
 0x44b   :  { %714 = dma.done.wait [#allocation4], 32  }
 0x44c   :  { %715 = vsyncadd [#allocation4], 4294967264 }
 0x44d   :  { %424 = vsyncpa [#allocation3], 1 }
 0x44e   :  { %425 = vsyncpa [#allocation6], 1 }
 0x44f   :  { %426 = vsyncpa [#allocation9], 1 }
 0x450   :  { %427 = vsyncpa [#allocation12], 1 }
 0x451   :  { %428 = vsyncpa [#allocation4], 1 }

</bundles_post_ra>
